<compile_context>
chip_gen: v7x
topology: tpu7x:2x2x1
jax: 0.10.0
libtpu: 0.0.40
codegen_flags: <defaults>
</compile_context>

<pallas_src>
import jax
import jax.numpy as jnp
from jax import lax
from jax.experimental import pallas as pl
from jax.experimental.pallas import tpu as pltpu


EPS = 1e-5
LANES = 128  # lane-dense width for hidden/out/params (128 ok for v5e; use 256 on
             # v6e/v7x once hidden dims exceed 128 -- see TODO above)


def _bn_relu_fused(h, gamma, beta):
    """Training-mode BN + ReLU in f32.

    Two-pass (centered) variance for numerical safety, but the scale/shift application
    is still fused:  gamma*(h-mu)*rsqrt(var+eps) + beta  ==  c*scale + beta.
    Padded-lane invariant: padded feature columns have h == 0, gamma == 0, beta == 0,
    so scale == 0 and the output stays exactly 0 in those lanes.  Do NOT pad gamma
    with ones -- that would leak rsqrt(eps)-scaled values into the padded lanes.
    """
    mu = jnp.mean(h, axis=0, keepdims=True)
    c = h - mu
    var = jnp.mean(c * c, axis=0, keepdims=True)     # biased batch variance, two-pass
    scale = gamma * lax.rsqrt(var + EPS)              # EUP rsqrt (free slot)
    return jnp.maximum(c * scale + beta, 0.0)


def simplenet_kernel(x_ref, w1_ref, w2_ref, w3_ref, p_ref, o_ref):
    p = p_ref[...]                                    # (8, 128) packed f32 param slab
    g1, be1 = p[0:1, :], p[1:2, :]
    g2, be2 = p[2:3, :], p[3:4, :]
    b3 = p[4:5, :]

    # layer1: Linear (bias cancelled by training-mode BN) + BN + ReLU
    h = jnp.dot(x_ref[...], w1_ref[...], preferred_element_type=jnp.float32)
    h = _bn_relu_fused(h, g1, be1)

    # layer2: Linear (bias cancelled by training-mode BN) + BN + ReLU
    h = jnp.dot(h.astype(jnp.bfloat16), w2_ref[...],
                preferred_element_type=jnp.float32)
    h = _bn_relu_fused(h, g2, be2)

    # layer3: Linear
    out = jnp.dot(h.astype(jnp.bfloat16), w3_ref[...],
                  preferred_element_type=jnp.float32) + b3
    o_ref[...] = out.astype(o_ref.dtype)


def simplenet_forward(x, params):
    (w1, b1, g1, be1, w2, b2, g2, be2, w3, b3) = params
    del b1, b2  # mathematically cancelled by training-mode BN mean subtraction
    B, in_dim = x.shape
    h1, h2, out_dim = w1.shape[1], w2.shape[1], w3.shape[1]
    assert max(h1, h2, out_dim) <= LANES, "toy-size kernel: feature dims must be <= 128"

    def pad_cols(a, n):
        return jnp.pad(a, ((0, 0), (0, n - a.shape[1])))

    def pad_rows(a, n):
        return jnp.pad(a, ((0, n - a.shape[0]), (0, 0)))

    # Lane-dense bf16 MXU operands: N padded to 128 zero columns, K padded where needed.
    x_bf = x.astype(jnp.bfloat16)                                      # (B, in_dim)
    w1p = pad_cols(w1, LANES).astype(jnp.bfloat16)                     # (in_dim, 128)
    w2p = pad_cols(pad_rows(w2, LANES), LANES).astype(jnp.bfloat16)    # (128, 128)
    w3p = pad_cols(pad_rows(w3, LANES), LANES).astype(jnp.bfloat16)    # (128, 128)

    # Single (8, 128) f32 parameter slab: rows = [g1, be1, g2, be2, b3, 0, 0, 0].
    # Zero padding (gamma included!) keeps padded feature lanes exactly zero through
    # BN/ReLU -- see _bn_relu_fused docstring.
    slab = jnp.concatenate(
        [pad_cols(g1, LANES), pad_cols(be1, LANES),
         pad_cols(g2, LANES), pad_cols(be2, LANES),
         pad_cols(b3, LANES),
         jnp.zeros((3, LANES), jnp.float32)], axis=0)                  # (8, 128)

    flops = 2 * B * (in_dim * LANES + LANES * LANES + LANES * LANES)
    bytes_accessed = (2 * (B * in_dim + in_dim * LANES + 2 * LANES * LANES)  # bf16
                      + 4 * (8 * LANES + B * LANES))                         # f32
    vmem = pl.BlockSpec(memory_space=pltpu.MemorySpace.VMEM)

    out_padded = pl.pallas_call(
        simplenet_kernel,
        out_shape=jax.ShapeDtypeStruct((B, LANES), jnp.float32),
        in_specs=[vmem] * 5,
        out_specs=vmem,
        compiler_params=pltpu.CompilerParams(vmem_limit_bytes=32 * 1024 * 1024),
        cost_estimate=pl.CostEstimate(flops=flops,
                                      transcendentals=2 * LANES,
                                      bytes_accessed=bytes_accessed),
    )(x_bf, w1p, w2p, w3p, slab)
    return out_padded[:, :out_dim]


def make_params(key, in_dim, hidden1, hidden2, out_dim):
    """Deterministic parameter init (uniform, like PyTorch default ranges)."""
    ks = jax.random.split(key, 6)

    def lin(kw, kb, fan_in, fan_out):
        bound = 1.0 / jnp.sqrt(fan_in)
        # stored as (in, out): PyTorch W (out, in) transposed
        w = jax.random.uniform(kw, (fan_in, fan_out), jnp.float32, -bound, bound)
        b = jax.random.uniform(kb, (1, fan_out), jnp.float32, -bound, bound)
        return w, b

    w1, b1 = lin(ks[0], ks[1], in_dim, hidden1)
    w2, b2 = lin(ks[2], ks[3], hidden1, hidden2)
    w3, b3 = lin(ks[4], ks[5], hidden2, out_dim)
    g1 = jnp.ones((1, hidden1), jnp.float32)
    be1 = jnp.zeros((1, hidden1), jnp.float32)
    g2 = jnp.ones((1, hidden2), jnp.float32)
    be2 = jnp.zeros((1, hidden2), jnp.float32)
    return (w1, b1, g1, be1, w2, b2, g2, be2, w3, b3)


def reference_forward(x, params):
    """Faithful f32 PyTorch-semantics reference (includes the b1/b2 biases)."""
    (w1, b1, g1, be1, w2, b2, g2, be2, w3, b3) = params

    def bn_relu(h, g, be):
        mu = jnp.mean(h, axis=0, keepdims=True)
        var = jnp.mean((h - mu) ** 2, axis=0, keepdims=True)
        return jnp.maximum(g * (h - mu) / jnp.sqrt(var + EPS) + be, 0.0)

    h1 = bn_relu(x @ w1 + b1, g1, be1)
    h2 = bn_relu(h1 @ w2 + b2, g2, be2)
    return h2 @ w3 + b3


if __name__ == "__main__":
    key = jax.random.PRNGKey(0)
    k_x, k_p = jax.random.split(key)

    batch, in_dim, hidden1, hidden2, out_dim = 8, 32, 64, 64, 16
    x = jax.random.normal(k_x, (batch, in_dim), jnp.float32)
    params = make_params(k_p, in_dim, hidden1, hidden2, out_dim)

    out = simplenet_forward(x, params)
    out = jax.block_until_ready(out)

    ref = reference_forward(x, params)
    assert out.shape == (batch, out_dim)
    # Tolerance sized for bf16 MXU operands (f32 accumulation, f32 BN math).
    assert jnp.allclose(out, ref, atol=5e-2, rtol=5e-2), "mismatch vs JAX reference"

    print("KERNEL_OK")
</pallas_src>

<mosaic_0001>
module attributes {stable_mosaic.version = 11 : i64} {
  func.func @simplenet_kernel(%arg0: memref<8x32xbf16, #tpu.memory_space<vmem>>, %arg1: memref<32x128xbf16, #tpu.memory_space<vmem>>, %arg2: memref<128x128xbf16, #tpu.memory_space<vmem>>, %arg3: memref<128x128xbf16, #tpu.memory_space<vmem>>, %arg4: memref<8x128xf32, #tpu.memory_space<vmem>>, %arg5: memref<8x128xf32, #tpu.memory_space<vmem>>) attributes {dimension_semantics = [], scalar_prefetch = 0 : i64, scratch_operands = 0 : i64, tpu.core_type = #tpu.core_type<tc>} {
    %c0 = arith.constant 0 : index
    %c0_0 = arith.constant 0 : index
    %0 = vector.load %arg4[%c0, %c0_0] : memref<8x128xf32, #tpu.memory_space<vmem>>, vector<8x128xf32>
    %1 = vector.extract_strided_slice %0 {offsets = [0, 0], sizes = [1, 128], strides = [1, 1]} : vector<8x128xf32> to vector<1x128xf32>
    %2 = vector.extract_strided_slice %0 {offsets = [1, 0], sizes = [1, 128], strides = [1, 1]} : vector<8x128xf32> to vector<1x128xf32>
    %3 = vector.extract_strided_slice %0 {offsets = [2, 0], sizes = [1, 128], strides = [1, 1]} : vector<8x128xf32> to vector<1x128xf32>
    %4 = vector.extract_strided_slice %0 {offsets = [3, 0], sizes = [1, 128], strides = [1, 1]} : vector<8x128xf32> to vector<1x128xf32>
    %5 = vector.extract_strided_slice %0 {offsets = [4, 0], sizes = [1, 128], strides = [1, 1]} : vector<8x128xf32> to vector<1x128xf32>
    %c0_1 = arith.constant 0 : index
    %c0_2 = arith.constant 0 : index
    %6 = vector.load %arg0[%c0_1, %c0_2] : memref<8x32xbf16, #tpu.memory_space<vmem>>, vector<8x32xbf16>
    %c0_3 = arith.constant 0 : index
    %c0_4 = arith.constant 0 : index
    %7 = vector.load %arg1[%c0_3, %c0_4] : memref<32x128xbf16, #tpu.memory_space<vmem>>, vector<32x128xbf16>
    %cst = arith.constant dense<0.000000e+00> : vector<8x128xf32>
    %8 = tpu.matmul %6, %7, %cst {dimension_numbers = #tpu.dot_dimension_numbers<[1], [0], [0], [1], [0, 0, 1, 1], [], []>} : vector<8x32xbf16>, vector<32x128xbf16>, vector<8x128xf32> -> vector<8x128xf32>
    %cst_5 = arith.constant dense<0.000000e+00> : vector<128xf32>
    %9 = vector.multi_reduction <add>, %8, %cst_5 [0] : vector<8x128xf32> to vector<128xf32>
    %10 = vector.shape_cast %9 : vector<128xf32> to vector<1x128xf32>
    %cst_6 = arith.constant 8.000000e+00 : f32
    %11 = vector.broadcast %cst_6 : f32 to vector<1x128xf32>
    %12 = arith.divf %10, %11 : vector<1x128xf32>
    %13 = vector.broadcast %12 : vector<1x128xf32> to vector<8x128xf32>
    %14 = arith.subf %8, %13 : vector<8x128xf32>
    %15 = arith.mulf %14, %14 : vector<8x128xf32>
    %cst_7 = arith.constant dense<0.000000e+00> : vector<128xf32>
    %16 = vector.multi_reduction <add>, %15, %cst_7 [0] : vector<8x128xf32> to vector<128xf32>
    %17 = vector.shape_cast %16 : vector<128xf32> to vector<1x128xf32>
    %cst_8 = arith.constant 8.000000e+00 : f32
    %18 = vector.broadcast %cst_8 : f32 to vector<1x128xf32>
    %19 = arith.divf %17, %18 : vector<1x128xf32>
    %cst_9 = arith.constant 9.99999974E-6 : f32
    %20 = vector.broadcast %cst_9 : f32 to vector<1x128xf32>
    %21 = arith.addf %19, %20 : vector<1x128xf32>
    %22 = math.rsqrt %21 : vector<1x128xf32>
    %23 = arith.mulf %1, %22 : vector<1x128xf32>
    %24 = vector.broadcast %23 : vector<1x128xf32> to vector<8x128xf32>
    %25 = arith.mulf %14, %24 : vector<8x128xf32>
    %26 = vector.broadcast %2 : vector<1x128xf32> to vector<8x128xf32>
    %27 = arith.addf %25, %26 : vector<8x128xf32>
    %cst_10 = arith.constant 0.000000e+00 : f32
    %28 = vector.broadcast %cst_10 : f32 to vector<8x128xf32>
    %29 = arith.maximumf %27, %28 : vector<8x128xf32>
    %30 = arith.truncf %29 : vector<8x128xf32> to vector<8x128xbf16>
    %c0_11 = arith.constant 0 : index
    %c0_12 = arith.constant 0 : index
    %31 = vector.load %arg2[%c0_11, %c0_12] : memref<128x128xbf16, #tpu.memory_space<vmem>>, vector<128x128xbf16>
    %cst_13 = arith.constant dense<0.000000e+00> : vector<8x128xf32>
    %32 = tpu.matmul %30, %31, %cst_13 {dimension_numbers = #tpu.dot_dimension_numbers<[1], [0], [0], [1], [0, 0, 1, 1], [], []>} : vector<8x128xbf16>, vector<128x128xbf16>, vector<8x128xf32> -> vector<8x128xf32>
    %cst_14 = arith.constant dense<0.000000e+00> : vector<128xf32>
    %33 = vector.multi_reduction <add>, %32, %cst_14 [0] : vector<8x128xf32> to vector<128xf32>
    %34 = vector.shape_cast %33 : vector<128xf32> to vector<1x128xf32>
    %cst_15 = arith.constant 8.000000e+00 : f32
    %35 = vector.broadcast %cst_15 : f32 to vector<1x128xf32>
    %36 = arith.divf %34, %35 : vector<1x128xf32>
    %37 = vector.broadcast %36 : vector<1x128xf32> to vector<8x128xf32>
    %38 = arith.subf %32, %37 : vector<8x128xf32>
    %39 = arith.mulf %38, %38 : vector<8x128xf32>
    %cst_16 = arith.constant dense<0.000000e+00> : vector<128xf32>
    %40 = vector.multi_reduction <add>, %39, %cst_16 [0] : vector<8x128xf32> to vector<128xf32>
    %41 = vector.shape_cast %40 : vector<128xf32> to vector<1x128xf32>
    %cst_17 = arith.constant 8.000000e+00 : f32
    %42 = vector.broadcast %cst_17 : f32 to vector<1x128xf32>
    %43 = arith.divf %41, %42 : vector<1x128xf32>
    %cst_18 = arith.constant 9.99999974E-6 : f32
    %44 = vector.broadcast %cst_18 : f32 to vector<1x128xf32>
    %45 = arith.addf %43, %44 : vector<1x128xf32>
    %46 = math.rsqrt %45 : vector<1x128xf32>
    %47 = arith.mulf %3, %46 : vector<1x128xf32>
    %48 = vector.broadcast %47 : vector<1x128xf32> to vector<8x128xf32>
    %49 = arith.mulf %38, %48 : vector<8x128xf32>
    %50 = vector.broadcast %4 : vector<1x128xf32> to vector<8x128xf32>
    %51 = arith.addf %49, %50 : vector<8x128xf32>
    %cst_19 = arith.constant 0.000000e+00 : f32
    %52 = vector.broadcast %cst_19 : f32 to vector<8x128xf32>
    %53 = arith.maximumf %51, %52 : vector<8x128xf32>
    %54 = arith.truncf %53 : vector<8x128xf32> to vector<8x128xbf16>
    %c0_20 = arith.constant 0 : index
    %c0_21 = arith.constant 0 : index
    %55 = vector.load %arg3[%c0_20, %c0_21] : memref<128x128xbf16, #tpu.memory_space<vmem>>, vector<128x128xbf16>
    %cst_22 = arith.constant dense<0.000000e+00> : vector<8x128xf32>
    %56 = tpu.matmul %54, %55, %cst_22 {dimension_numbers = #tpu.dot_dimension_numbers<[1], [0], [0], [1], [0, 0, 1, 1], [], []>} : vector<8x128xbf16>, vector<128x128xbf16>, vector<8x128xf32> -> vector<8x128xf32>
    %57 = vector.broadcast %5 : vector<1x128xf32> to vector<8x128xf32>
    %58 = arith.addf %56, %57 : vector<8x128xf32>
    %c0_23 = arith.constant 0 : index
    %c0_24 = arith.constant 0 : index
    %59 = vector.load %arg5[%c0_23, %c0_24] : memref<8x128xf32, #tpu.memory_space<vmem>>, vector<8x128xf32>
    tpu.vector_store %arg5[%c0_23, %c0_24], %58 {strides = array<i32>} : memref<8x128xf32, #tpu.memory_space<vmem>>, vector<8x128xf32>,
    return
  }
}

</mosaic_0001>

<bundles_post_ra>
// kernel: tpu_custom_call.1
= control target key start
LH: loop header
LB: loop body
LE: loop exit
PB: predicated region body
PF: predicated region fallthrough
CT: control target
= control target key end

     0   :  { %10 = vsyncpa [#allocation3], 0  ;;  %s813_s0 = inlined_call_operand.hbm [shape: bf16[8,32], index: 0, kind: input, shape index: {}]   ;;  %s814_s1 = inlined_call_operand.hbm [shape: bf16[32,128], index: 1, kind: input, shape index: {}]   ;;  %s815_s2 = inlined_call_operand.hbm [shape: bf16[128,128], index: 2, kind: input, shape index: {}]   ;;  %s816_s3 = inlined_call_operand.hbm [shape: bf16[128,128], index: 3, kind: input, shape index: {}]   ;;  %s817_s4 = inlined_call_operand.vmem [shape: f32[8,128], index: 4, kind: input, shape index: {}]   ;;  %s818_s5 = inlined_call_operand.hbm [shape: f32[8,128], index: 5, kind: output, shape index: {}]  }
   0x1   :  { %11 = vsyncpa [#allocation6], 0 }
   0x2   :  { %12 = vsyncpa [#allocation9], 0 }
   0x3   :  { %13 = vsyncpa [#allocation4], 0  ;;  %s667_s18 = smov [#allocation5]   ;;  %s549_s22 = scalar_lea.hbm %s814_s1, 256 }
   0x4   :  { %s29_s19 = sshll.u32 %s667_s18, 4  ;;  %p550_p0 = scmp.ne.s32.totalorder %s814_s1, %s549_s22  ;;  %s30_s19 = int_to_ptr.vmem [resolvable:$true] %s29_s19 }
   0x5   :  { %p553_p1 = scmp.lt.u32.totalorder %s549_s22, %s814_s1 }
   0x7   :  { %p555_p2 = pnand %p553_p1, %p550_p0 }
   0x9   :  { %558 = shalt.err (!%p555_p2)
}
   0xa   :  { %s559_s27 = scalar_lea.vmem %s30_s19, 256  ;;  %p564_p4 = scmp.lt.s32.totalorder %s30_s19, %s30_s19 }
   0xb   :  { %p560_p3 = scmp.ne.s32.totalorder %s30_s19, %s559_s27  ;;  %p565_p5 = scmp.lt.s32.totalorder %s559_s27, %s559_s27 }
   0xd   :  { %p566_p6 = por %p565_p5, %p564_p4 }
   0xf   :  { %p567_p7 = pnand %p566_p6, %p560_p3 }
  0x11   :  { %570 = shalt.err (!%p567_p7)
}
  0x12   :  { %s668_s28 = smov 64   ;;  %s669_s29 = smov 4  }
  0x13   :  { %35 = dma.hbm_to_vmem [thread:$0]  %s814_s1, 256, %s30_s19, [#allocation6], %s668_s28, %s668_s28, %s669_s29  }
  0x14   :  { %s670_s7 = smov [#allocation2]   ;;  %s671_s9 = smov [#allocation7]  }
  0x15   :  { %s20_s8 = sshll.u32 %s670_s7, 4  ;;  %s41_s10 = sshll.u32 %s671_s9, 4  ;;  %s21_s8 = int_to_ptr.vmem [resolvable:$true] %s20_s8  ;;  %s42_s10 = int_to_ptr.vmem [resolvable:$true] %s41_s10 }
  0x16   :  { %s571_s13 = scalar_lea.hbm %s813_s0, 64 }
  0x17   :  { %p572_p8 = scmp.ne.s32.totalorder %s813_s0, %s571_s13  ;;  %p575_p9 = scmp.lt.u32.totalorder %s571_s13, %s813_s0 }
  0x19   :  { %p577_p10 = pnand %p575_p9, %p572_p8 }
  0x1b   :  { %580 = shalt.err (!%p577_p10)
}
  0x1c   :  { %s581_s1 = scalar_lea.vmem %s21_s8, 64  ;;  %p586_p12 = scmp.lt.s32.totalorder %s21_s8, %s21_s8 }
  0x1d   :  { %p582_p11 = scmp.ne.s32.totalorder %s21_s8, %s581_s1  ;;  %p587_p13 = scmp.lt.s32.totalorder %s581_s1, %s581_s1 }
  0x1f   :  { %p588_p0 = por %p587_p13, %p586_p12 }
  0x21   :  { %p589_p1 = pnand %p588_p0, %p582_p11 }
  0x23   :  { %592 = shalt.err (!%p589_p1)
}
  0x24   :  { %23 = dma.hbm_to_vmem [thread:$0]  %s813_s0, 64, %s21_s8, [#allocation3]  }
  0x25   :  { %s593_s22 = scalar_lea.hbm %s815_s2, 1024 }
  0x26   :  { %p594_p2 = scmp.ne.s32.totalorder %s815_s2, %s593_s22  ;;  %p597_p3 = scmp.lt.u32.totalorder %s593_s22, %s815_s2 }
  0x28   :  { %p599_p4 = pnand %p597_p3, %p594_p2 }
  0x2a   :  { %602 = shalt.err (!%p599_p4)
}
  0x2b   :  { %s603_s27 = scalar_lea.vmem %s42_s10, 1024  ;;  %p608_p6 = scmp.lt.s32.totalorder %s42_s10, %s42_s10 }
  0x2c   :  { %p604_p5 = scmp.ne.s32.totalorder %s42_s10, %s603_s27  ;;  %p609_p7 = scmp.lt.s32.totalorder %s603_s27, %s603_s27 }
  0x2e   :  { %p610_p8 = por %p609_p7, %p608_p6 }
  0x30   :  { %p611_p9 = pnand %p610_p8, %p604_p5 }
  0x32   :  { %614 = shalt.err (!%p611_p9)
}
  0x33   :  { %47 = dma.hbm_to_vmem [thread:$0]  %s815_s2, 1024, %s42_s10, [#allocation6], %s668_s28, %s668_s28, %s669_s29  }
  0x34   :  { %s672_s6 = smov [#allocation8]   ;;  %s615_s11 = scalar_lea.hbm %s816_s3, 1024 }
  0x35   :  { %s53_s7 = sshll.u32 %s672_s6, 4  ;;  %p616_p10 = scmp.ne.s32.totalorder %s816_s3, %s615_s11  ;;  %s54_s7 = int_to_ptr.vmem [resolvable:$true] %s53_s7 }
  0x36   :  { %p619_p11 = scmp.lt.u32.totalorder %s615_s11, %s816_s3 }
  0x38   :  { %p621_p12 = pnand %p619_p11, %p616_p10 }
  0x3a   :  { %624 = shalt.err (!%p621_p12)
}
  0x3b   :  { %s625_s16 = scalar_lea.vmem %s54_s7, 1024  ;;  %p630_p0 = scmp.lt.s32.totalorder %s54_s7, %s54_s7 }
  0x3c   :  { %p626_p13 = scmp.ne.s32.totalorder %s54_s7, %s625_s16  ;;  %p631_p1 = scmp.lt.s32.totalorder %s625_s16, %s625_s16 }
  0x3e   :  { %p632_p2 = por %p631_p1, %p630_p0 }
  0x40   :  { %p633_p3 = pnand %p632_p2, %p626_p13 }
  0x42   :  { %636 = shalt.err (!%p633_p3)
}
  0x43   :  { %59 = dma.hbm_to_vmem [thread:$0]  %s816_s3, 1024, %s54_s7, [#allocation9], %s668_s28, %s668_s28, %s669_s29  }
  0x44   :  { %659 = dma.done.wait [#allocation3], 64  }
  0x45   :  { %660 = vsyncadd [#allocation3], 4294967232 }
  0x46   :  { %661 = dma.done.wait [#allocation6], 1280  }
  0x47   :  { %662 = vsyncadd [#allocation6], 4294966016 }
  0x48   :  { %663 = dma.done.wait [#allocation9], 1024  }
  0x49   :  { %664 = vsyncadd [#allocation9], 4294966272  ;;  %v673_v0 = vmov 0.0   ;;  %vm674_vm0 = vmmov 0   ;;  %v527_v1 = vld [vmem:[#allocation5] sm:$0xff]   ;;  %v528_v2 = vld [vmem:[#allocation5 + $0x8] sm:$0xff]   ;;  %v157_v33 = vlaneseq }
  0x4a   :  { %470 = vmatprep.subr.bf16.mxu0 %v673_v0  ;;  %474 = vmatprep.mubr.msk.bf16.mxu0 %vm674_vm0, %v673_v0  ;;  %vm93_vm1 = vcmask 261120   ;;  %v76_v3 = vld [vmem:[#allocation2] sm:$0xf]  ;;  %v529_v4 = vld [vmem:[#allocation7] sm:$0xff]   ;;  %v531_v6 = vld [vmem:[#allocation7 + $0x10] sm:$0xff]  }
  0x4b   :  { %478 = vmatprep.subr.bf16.mxu1 %v673_v0  ;;  %494 = vmatprep.mubr.msk.bf16.mxu1 %vm674_vm0, %v673_v0  ;;  %v530_v5 = vld [vmem:[#allocation7 + $0x8] sm:$0xff]   ;;  %v532_v7 = vld [vmem:[#allocation7 + $0x18] sm:$0xff]   ;;  %v533_v8 = vld [vmem:[#allocation7 + $0x20] sm:$0xff]   ;;  %v777_v34 = vshrl.u32 %v157_v33, 7 }
  0x4c   :  { %471 = vmatpush3.bf16.msra.mxu0 %v527_v1  ;;  %479 = vmatpush3.bf16.msra.mxu1 %v529_v4  ;;  %v534_v9 = vld [vmem:[#allocation7 + $0x28] sm:$0xff]   ;;  %v535_v10 = vld [vmem:[#allocation7 + $0x30] sm:$0xff]   ;;  %v536_v11 = vld [vmem:[#allocation7 + $0x38] sm:$0xff]  }
  0x4d   :  { %472 = vmatprep.subr.bf16.mxu0 %v673_v0  ;;  %480 = vmatprep.subr.bf16.mxu1 %v673_v0  ;;  %v782_v35 = vld [vmem:[%s817_s4] sm:$0xff]  ;;  %v159_v36 = vsub.s32 0, %v777_v34  ;;  %v164_v37 = vsub.s32 1, %v777_v34  ;;  %v539_v48 = vld [vmem:[#allocation8 + $0x10] sm:$0xff]   ;;  %v540_v49 = vld [vmem:[#allocation8 + $0x18] sm:$0xff]   ;;  %s675_s4 = smov [#allocation10]  }
  0x4e   :  { %v537_v46 = vld [vmem:[#allocation8] sm:$0xff]   ;;  %v538_v47 = vld [vmem:[#allocation8 + $0x8] sm:$0xff]   ;;  %v543_v52 = vld [vmem:[#allocation8 + $0x30] sm:$0xff]   ;;  %s419_s29 = sshll.u32 %s675_s4, 4  ;;  %s420_s29 = int_to_ptr.vmem [resolvable:$true] %s419_s29 }
  0x4f   :  { %v165_v41 = vrot.slane %v782_v35, %v164_v37  ;;  %v541_v50 = vld [vmem:[#allocation8 + $0x20] sm:$0xff]   ;;  %v542_v51 = vld [vmem:[#allocation8 + $0x28] sm:$0xff]   ;;  %v544_v53 = vld [vmem:[#allocation8 + $0x38] sm:$0xff]   ;;  %s637_s17 = scalar_lea.vmem %s420_s29, 128  ;;  %p642_p5 = scmp.lt.s32.totalorder %s420_s29, %s420_s29 }
  0x50   :  { %473 = vmatpush3.bf16.msra.mxu0 %v528_v2  ;;  %481 = vmatpush3.bf16.msra.mxu1 %v530_v5  ;;  %p638_p4 = scmp.ne.s32.totalorder %s420_s29, %s637_s17  ;;  %p643_p6 = scmp.lt.s32.totalorder %s637_s17, %s637_s17 }
  0x51   :  { %498 = vmatprep.subr.bf16.mxu0 %v673_v0  ;;  %482 = vmatprep.subr.bf16.mxu1 %v673_v0 }
  0x52   :  { %p644_p7 = por %p643_p6, %p642_p5 }
  0x53   :  { %475 = vmatmul.mubr.msk.bf16.vlgmr.msra.gmra.mrb[0].mxu0 %vm93_vm1, %v76_v3 }
  0x54   :  { %514 = vmatprep.mubr.msk.bf16.mxu0 %vm674_vm0, %v673_v0  ;;  %483 = vmatpush3.bf16.msra.mxu1 %v531_v6  ;;  %p645_p8 = pnand %p644_p7, %p638_p4 }
  0x55   :  { %484 = vmatprep.subr.bf16.mxu1 %v673_v0  ;;  %499 = vmatpush3.bf16.msra.mxu0 %v537_v46 }
  0x56   :  { %500 = vmatprep.subr.bf16.mxu0 %v673_v0 }
  0x58   :  { %485 = vmatpush3.bf16.msra.mxu1 %v532_v7 }
  0x59   :  { %486 = vmatprep.subr.bf16.mxu1 %v673_v0  ;;  %501 = vmatpush3.bf16.msra.mxu0 %v538_v47 }
  0x5a   :  { %502 = vmatprep.subr.bf16.mxu0 %v673_v0 }
  0x5c   :  { %487 = vmatpush3.bf16.msra.mxu1 %v533_v8 }
  0x5d   :  { %488 = vmatprep.subr.bf16.mxu1 %v673_v0  ;;  %503 = vmatpush3.bf16.msra.mxu0 %v539_v48 }
  0x5e   :  { %504 = vmatprep.subr.bf16.mxu0 %v673_v0 }
  0x60   :  { %489 = vmatpush3.bf16.msra.mxu1 %v534_v9 }
  0x61   :  { %490 = vmatprep.subr.bf16.mxu1 %v673_v0  ;;  %505 = vmatpush3.bf16.msra.mxu0 %v540_v49 }
  0x62   :  { %506 = vmatprep.subr.bf16.mxu0 %v673_v0 }
  0x64   :  { %491 = vmatpush3.bf16.msra.mxu1 %v535_v10 }
  0x65   :  { %492 = vmatprep.subr.bf16.mxu1 %v673_v0  ;;  %507 = vmatpush3.bf16.msra.mxu0 %v541_v50 }
  0x66   :  { %508 = vmatprep.subr.bf16.mxu0 %v673_v0 }
  0x68   :  { %493 = vmatpush3.bf16.msra.mxu1 %v536_v11  ;;  %v294_v11 = vsub.s32 2, %v777_v34 }
  0x69   :  { %509 = vmatpush3.bf16.msra.mxu0 %v542_v51 }
  0x6a   :  { %510 = vmatprep.subr.bf16.mxu0 %v673_v0 }
  0x6d   :  { %511 = vmatpush3.bf16.msra.mxu0 %v543_v52 }
  0x6e   :  { %512 = vmatprep.subr.bf16.mxu0 %v673_v0 }
  0x71   :  { %513 = vmatpush3.bf16.msra.mxu0 %v544_v53 }
 0x126   :  { %v131_v12 = vpop.f32.mrb[0].mxu0 }
 0x127   :  { %v137_v13 = vrot.slane %v131_v12, 4  ;;  %v476_v14 = vpop.f32.mrb[1].mxu0 }
 0x128   :  { %v134_v15 = vpop.f32.mrb[2].mxu0 }
 0x129   :  { %v138_v16 = vadd.f32 %v137_v13, %v131_v12  ;;  %v477_v17 = vpop.f32.mrb[3].mxu0 }
 0x12b   :  { %v139_v18 = vrot.slane %v138_v16, 2 }
 0x12d   :  { %v140_v19 = vadd.f32 %v139_v18, %v138_v16 }
 0x12f   :  { %v141_v20 = vrot.slane %v140_v19, 1 }
 0x131   :  { %v142_v21 = vadd.f32 %v141_v20, %v140_v19 }
 0x133   :  { %v144_v22 = vmul.f32 0.125, %v142_v21  ;;  %v322_v21 = vsub.s32 4, %v777_v34 }
 0x135   :  { %v145_v23 = vsub.f32 %v131_v12, %v144_v22  ;;  %v299_v12 = vsub.s32 3, %v777_v34  ;;  %v323_v22 = vrot.slane %v782_v35, %v322_v21 }
 0x137   :  { %v146_v24 = vmul.f32 %v145_v23, %v145_v23  ;;  %v300_v16 = vrot.slane %v782_v35, %v299_v12 }
 0x139   :  { %v147_v25 = vrot.slane %v146_v24, 4 }
 0x13b   :  { %v148_v26 = vadd.f32 %v147_v25, %v146_v24 }
 0x13d   :  { %v149_v27 = vrot.slane %v148_v26, 2 }
 0x13f   :  { %v150_v28 = vadd.f32 %v149_v27, %v148_v26 }
 0x141   :  { %v151_v29 = vrot.slane %v150_v28, 1 }
 0x143   :  { %v152_v30 = vadd.f32 %v151_v29, %v150_v28 }
 0x145   :  { %v153_v31 = vmul.f32 0.125, %v152_v30 }
 0x147   :  { %v154_v32 = vadd.f32 1e-05, %v153_v31 }
 0x149   :  { %545 = vrsqrt.f32 %v154_v32 }
 0x153   :  { %v546_v38 = vpop.eup %545 }
 0x154   :  { %v156_v39 = vmul.f32 %v546_v38, %v782_v35 }
 0x156   :  { %v160_v40 = vrot.slane %v156_v39, %v159_v36 }
 0x158   :  { %v161_v42 = vmul.f32 %v160_v40, %v145_v23 }
 0x15a   :  { %v166_v43 = vadd.f32 %v165_v41, %v161_v42 }
 0x15c   :  { %v167_v44 = vmax.f32 %v166_v43, 0.0 }
 0x15e   :  { %v168_v45 = vpack.c.bf16 %v167_v44, %v167_v44 }
 0x160   :  { %495 = vmatmul.mubr.bf16.vlgmr.msra.gmra.mrb[0].mxu1 %v168_v45 }
 0x233   :  { %v267_v54 = vpop.f32.mrb[0].mxu1 }
 0x234   :  { %v273_v55 = vrot.slane %v267_v54, 4  ;;  %v496_v56 = vpop.f32.mrb[1].mxu1 }
 0x235   :  { %v270_v57 = vpop.f32.mrb[2].mxu1 }
 0x236   :  { %v274_v58 = vadd.f32 %v273_v55, %v267_v54  ;;  %v497_v59 = vpop.f32.mrb[3].mxu1 }
 0x238   :  { %v275_v60 = vrot.slane %v274_v58, 2 }
 0x23a   :  { %v276_v61 = vadd.f32 %v275_v60, %v274_v58 }
 0x23c   :  { %v277_v62 = vrot.slane %v276_v61, 1 }
 0x23e   :  { %v278_v63 = vadd.f32 %v277_v62, %v276_v61 }
 0x240   :  { %v279_v1 = vmul.f32 0.125, %v278_v63 }
 0x242   :  { %v280_v2 = vsub.f32 %v267_v54, %v279_v1 }
 0x244   :  { %v281_v3 = vmul.f32 %v280_v2, %v280_v2 }
 0x246   :  { %v282_v4 = vrot.slane %v281_v3, 4 }
 0x248   :  { %v283_v5 = vadd.f32 %v282_v4, %v281_v3 }
 0x24a   :  { %v284_v6 = vrot.slane %v283_v5, 2 }
 0x24c   :  { %v285_v7 = vadd.f32 %v284_v6, %v283_v5 }
 0x24e   :  { %v286_v0 = vrot.slane %v285_v7, 1 }
 0x250   :  { %v287_v8 = vadd.f32 %v286_v0, %v285_v7 }
 0x252   :  { %v288_v9 = vmul.f32 0.125, %v287_v8 }
 0x254   :  { %v289_v10 = vadd.f32 1e-05, %v288_v9 }
 0x256   :  { %547 = vrsqrt.f32 %v289_v10 }
 0x260   :  { %v548_v13 = vpop.eup %547 }
 0x261   :  { %v291_v14 = vmul.f32 %v548_v13, %v782_v35 }
 0x263   :  { %v295_v15 = vrot.slane %v291_v14, %v294_v11 }
 0x265   :  { %v296_v17 = vmul.f32 %v295_v15, %v280_v2 }
 0x267   :  { %v301_v18 = vadd.f32 %v300_v16, %v296_v17 }
 0x269   :  { %v302_v19 = vmax.f32 %v301_v18, 0.0 }
 0x26b   :  { %v303_v20 = vpack.c.bf16 %v302_v19, %v302_v19 }
 0x26d   :  { %515 = vmatmul.mubr.bf16.vlgmr.msra.gmra.mrb[4].mxu0 %v303_v20 }
 0x340   :  { %v406_v23 = vpop.f32.mrb[4].mxu0 }
 0x341   :  { %v407_v24 = vadd.f32 %v406_v23, %v323_v22  ;;  %v516_v25 = vpop.f32.mrb[5].mxu0 }
 0x342   :  { %v409_v26 = vpop.f32.mrb[6].mxu0 }
 0x343   :  { %412 = vst [vmem:[#allocation10] sm:$0xff] %v407_v24  ;;  %v517_v27 = vpop.f32.mrb[7].mxu0 }
 0x344   :  { %648 = shalt.err (!%p645_p8)
}
 0x345   :  { %s649_s19 = scalar_lea.hbm %s818_s5, 128 }
 0x346   :  { %p650_p9 = scmp.ne.s32.totalorder %s818_s5, %s649_s19  ;;  %p653_p10 = scmp.lt.u32.totalorder %s649_s19, %s818_s5 }
 0x348   :  { %p655_p11 = pnand %p653_p10, %p650_p9 }
 0x34a   :  { %658 = shalt.err (!%p655_p11)
}
 0x34b   :  { %422 = dma.vmem_to_hbm [thread:$0]  %s420_s29, 128, %s818_s5, [#allocation4]  }
 0x34c   :  { %665 = dma.done.wait [#allocation4], 128  }
 0x34d   :  { %666 = vsyncadd [#allocation4], 4294967168 }
 0x34e   :  { %426 = vsyncpa [#allocation3], 1 }
 0x34f   :  { %427 = vsyncpa [#allocation6], 1 }
 0x350   :  { %428 = vsyncpa [#allocation9], 1 }
 0x351   :  { %429 = vsyncpa [#allocation4], 1 }

</bundles_post_ra>
